<compile_context>
chip_gen: v6e
topology: v6e:2x2x1
jax: 0.10.0
libtpu: 0.0.40
codegen_flags: <defaults>
</compile_context>

<pallas_src>
import jax
import jax.numpy as jnp
from jax.experimental import pallas as pl
from jax.experimental.pallas import tpu as pltpu


def mlp_kernel(xT_ref, w1_ref, b1_ref, w2_ref, b2_ref, oT_ref):
    # xT_ref: (in, TB), w1_ref: (hid, in), b1_ref: (hid, 1)
    # w2_ref: (out, hid), b2_ref: (out, 1), oT_ref: (out, TB)
    h = jnp.dot(w1_ref[...], xT_ref[...], preferred_element_type=jnp.float32)
    h = jnp.maximum(h + b1_ref[...], 0.0)            # (hid, TB)
    y = jnp.dot(w2_ref[...], h, preferred_element_type=jnp.float32)
    y = jnp.maximum(y + b2_ref[...], 0.0)            # (out, TB)
    oT_ref[...] = y.astype(oT_ref.dtype)             # no-op for f32 output


def _round_up(x, m):
    return ((x + m - 1) // m) * m


def _pick_tb(B, target):
    if B <= 128:
        # Single block whose dims equal the full array dims (always legal),
        # so tiny batches don't DMA 128-wide mostly-padding tiles.
        return B
    # Multiple of 128 (lane constraint), capped so
    #  - we never exceed one round_up(B,128) worth of batch,
    #  - there are at least 2 tiles for v7x's two TensorCores.
    return min(target, _round_up(B, 128), _round_up(pl.cdiv(B, 2), 128))


def mlp_forward(x, w1, b1, w2, b2, *, tb_target=131072):
    """x: [B, in] f32.  w1: [hid, in], b1: [hid], w2: [out, hid], b2: [out]."""
    B, in_dim = x.shape
    hid_dim, _ = w1.shape
    out_dim, _ = w2.shape

    tb = _pick_tb(B, tb_target)
    n_tiles = pl.cdiv(B, tb)          # ragged trailing block handled by Pallas

    # Feature-major input for lane-dense tiles.
    # TODO(synk): fuse this transpose into x's producer / accept (in, B) input.
    xT = x.T                                           # (in, B)
    b1c = b1.reshape(hid_dim, 1)
    b2c = b2.reshape(out_dim, 1)

    cost = pl.CostEstimate(
        flops=int(2 * B * (in_dim * hid_dim + hid_dim * out_dim)),
        transcendentals=0,
        bytes_accessed=int(4 * B * (in_dim + out_dim)
                           + 4 * (w1.size + b1.size + w2.size + b2.size)),
    )

    outT = pl.pallas_call(
        mlp_kernel,
        out_shape=jax.ShapeDtypeStruct((out_dim, B), jnp.float32),
        grid=(n_tiles,),
        in_specs=[
            pl.BlockSpec((in_dim, tb), lambda i: (0, i)),        # x^T streams
            pl.BlockSpec((hid_dim, in_dim), lambda i: (0, 0)),   # W1 resident
            pl.BlockSpec((hid_dim, 1), lambda i: (0, 0)),        # b1 resident
            pl.BlockSpec((out_dim, hid_dim), lambda i: (0, 0)),  # W2 resident
            pl.BlockSpec((out_dim, 1), lambda i: (0, 0)),        # b2 resident
        ],
        out_specs=pl.BlockSpec((out_dim, tb), lambda i: (0, i)),
        compiler_params=pltpu.CompilerParams(
            dimension_semantics=("parallel",),        # v7x: shard tiles on 2 TCs
            vmem_limit_bytes=48 * 1024 * 1024,        # big double-buffered tiles
        ),
        cost_estimate=cost,
    )(xT, w1, b1c, w2, b2c)

    # Back to the module's [B, out] layout.
    # TODO(synk): if the consumer accepts (out, B), return outT directly.
    return outT.T


def init_params(key):
    # Mimics nn.Linear's uniform(-1/sqrt(fan_in), +1/sqrt(fan_in)).
    k1, k2, k3, k4 = jax.random.split(key, 4)
    bound1 = 1.0 / jnp.sqrt(5.0)
    bound2 = 1.0 / jnp.sqrt(8.0)
    w1 = jax.random.uniform(k1, (8, 5), jnp.float32, -bound1, bound1)  # [out, in]
    b1 = jax.random.uniform(k2, (8,), jnp.float32, -bound1, bound1)
    w2 = jax.random.uniform(k3, (2, 8), jnp.float32, -bound2, bound2)
    b2 = jax.random.uniform(k4, (2,), jnp.float32, -bound2, bound2)
    return w1, b1, w2, b2


def _reference(x, w1, b1, w2, b2):
    # PyTorch layout: y = x @ W.T + b
    return jnp.maximum(jnp.maximum(x @ w1.T + b1, 0.0) @ w2.T + b2, 0.0)


if __name__ == "__main__":
    key = jax.random.PRNGKey(0)
    kx, kp, kx2 = jax.random.split(key, 3)
    w1, b1, w2, b2 = init_params(kp)

    # Small case matching the module's natural usage (B=4, 5 features).
    B = 4
    x = jax.random.normal(kx, (B, 5), jnp.float32)
    out = jax.block_until_ready(mlp_forward(x, w1, b1, w2, b2))
    ref = _reference(x, w1, b1, w2, b2)
    assert out.shape == (B, 2)
    assert jnp.allclose(out, ref, atol=1e-5, rtol=1e-5), "mismatch vs reference (B=4)"

    # Multi-tile + ragged trailing block sanity check (2 tiles of 256, last
    # one partial) — exercises the no-pad / masked-OOB-store path.
    B2 = 300
    x2 = jax.random.normal(kx2, (B2, 5), jnp.float32)
    out2 = jax.block_until_ready(mlp_forward(x2, w1, b1, w2, b2))
    ref2 = _reference(x2, w1, b1, w2, b2)
    assert out2.shape == (B2, 2)
    assert jnp.allclose(out2, ref2, atol=1e-5, rtol=1e-5), "mismatch vs reference (B=300)"

    print("KERNEL_OK")
</pallas_src>

<mosaic_0001>
module attributes {stable_mosaic.version = 11 : i64} {
  func.func @mlp_kernel(%arg0: i32, %arg1: memref<5x4xf32, #tpu.memory_space<vmem>>, %arg2: memref<8x5xf32, #tpu.memory_space<vmem>>, %arg3: memref<8x1xf32, #tpu.memory_space<vmem>>, %arg4: memref<2x8xf32, #tpu.memory_space<vmem>>, %arg5: memref<2x1xf32, #tpu.memory_space<vmem>>, %arg6: memref<2x4xf32, #tpu.memory_space<vmem>>) attributes {dimension_semantics = [#tpu.dimension_semantics<parallel>], iteration_bounds = array<i64: 1>, scalar_prefetch = 0 : i64, scratch_operands = 0 : i64, tpu.core_type = #tpu.core_type<tc>, window_params = [{transform_indices = @transform_0, window_bounds = array<i64: 5, 4>}, {pipeline_mode = #tpu.pipeline_mode<synchronous>, transform_indices = @transform_1, window_bounds = array<i64: 8, 5>}, {pipeline_mode = #tpu.pipeline_mode<synchronous>, transform_indices = @transform_2, window_bounds = array<i64: 8, 1>}, {pipeline_mode = #tpu.pipeline_mode<synchronous>, transform_indices = @transform_3, window_bounds = array<i64: 2, 8>}, {pipeline_mode = #tpu.pipeline_mode<synchronous>, transform_indices = @transform_4, window_bounds = array<i64: 2, 1>}, {transform_indices = @transform_5, window_bounds = array<i64: 2, 4>}]} {
    %c0 = arith.constant 0 : index
    %c0_0 = arith.constant 0 : index
    %0 = vector.load %arg2[%c0, %c0_0] : memref<8x5xf32, #tpu.memory_space<vmem>>, vector<8x5xf32>
    %c0_1 = arith.constant 0 : index
    %c0_2 = arith.constant 0 : index
    %1 = vector.load %arg1[%c0_1, %c0_2] : memref<5x4xf32, #tpu.memory_space<vmem>>, vector<5x4xf32>
    %cst = arith.constant dense<0.000000e+00> : vector<8x4xf32>
    %2 = tpu.matmul %0, %1, %cst {dimension_numbers = #tpu.dot_dimension_numbers<[1], [0], [0], [1], [0, 0, 1, 1], [], []>} : vector<8x5xf32>, vector<5x4xf32>, vector<8x4xf32> -> vector<8x4xf32>
    %c0_3 = arith.constant 0 : index
    %c0_4 = arith.constant 0 : index
    %3 = vector.load %arg3[%c0_3, %c0_4] : memref<8x1xf32, #tpu.memory_space<vmem>>, vector<8x1xf32>
    %4 = vector.broadcast %3 : vector<8x1xf32> to vector<8x4xf32>
    %5 = arith.addf %2, %4 : vector<8x4xf32>
    %cst_5 = arith.constant 0.000000e+00 : f32
    %6 = vector.broadcast %cst_5 : f32 to vector<8x4xf32>
    %7 = arith.maximumf %5, %6 : vector<8x4xf32>
    %c0_6 = arith.constant 0 : index
    %c0_7 = arith.constant 0 : index
    %8 = vector.load %arg4[%c0_6, %c0_7] : memref<2x8xf32, #tpu.memory_space<vmem>>, vector<2x8xf32>
    %cst_8 = arith.constant dense<0.000000e+00> : vector<2x4xf32>
    %9 = tpu.matmul %8, %7, %cst_8 {dimension_numbers = #tpu.dot_dimension_numbers<[1], [0], [0], [1], [0, 0, 1, 1], [], []>} : vector<2x8xf32>, vector<8x4xf32>, vector<2x4xf32> -> vector<2x4xf32>
    %c0_9 = arith.constant 0 : index
    %c0_10 = arith.constant 0 : index
    %10 = vector.load %arg5[%c0_9, %c0_10] : memref<2x1xf32, #tpu.memory_space<vmem>>, vector<2x1xf32>
    %11 = vector.broadcast %10 : vector<2x1xf32> to vector<2x4xf32>
    %12 = arith.addf %9, %11 : vector<2x4xf32>
    %cst_11 = arith.constant 0.000000e+00 : f32
    %13 = vector.broadcast %cst_11 : f32 to vector<2x4xf32>
    %14 = arith.maximumf %12, %13 : vector<2x4xf32>
    %c0_12 = arith.constant 0 : index
    %c0_13 = arith.constant 0 : index
    %15 = vector.load %arg6[%c0_12, %c0_13] : memref<2x4xf32, #tpu.memory_space<vmem>>, vector<2x4xf32>
    tpu.vector_store %arg6[%c0_12, %c0_13], %14 {strides = array<i32>} : memref<2x4xf32, #tpu.memory_space<vmem>>, vector<2x4xf32>,
    return
  }
  func.func @transform_0(%arg0: i32) -> (i32, i32) {
    %c0_i32 = arith.constant 0 : i32
    %c0_i32_0 = arith.constant 0 : i32
    return %c0_i32, %arg0 : i32, i32
  }
  func.func @transform_1(%arg0: i32) -> (i32, i32) {
    %c0_i32 = arith.constant 0 : i32
    %c0_i32_0 = arith.constant 0 : i32
    %c0_i32_1 = arith.constant 0 : i32
    return %c0_i32, %c0_i32_0 : i32, i32
  }
  func.func @transform_2(%arg0: i32) -> (i32, i32) {
    %c0_i32 = arith.constant 0 : i32
    %c0_i32_0 = arith.constant 0 : i32
    %c0_i32_1 = arith.constant 0 : i32
    return %c0_i32, %c0_i32_0 : i32, i32
  }
  func.func @transform_3(%arg0: i32) -> (i32, i32) {
    %c0_i32 = arith.constant 0 : i32
    %c0_i32_0 = arith.constant 0 : i32
    %c0_i32_1 = arith.constant 0 : i32
    return %c0_i32, %c0_i32_0 : i32, i32
  }
  func.func @transform_4(%arg0: i32) -> (i32, i32) {
    %c0_i32 = arith.constant 0 : i32
    %c0_i32_0 = arith.constant 0 : i32
    %c0_i32_1 = arith.constant 0 : i32
    return %c0_i32, %c0_i32_0 : i32, i32
  }
  func.func @transform_5(%arg0: i32) -> (i32, i32) {
    %c0_i32 = arith.constant 0 : i32
    %c0_i32_0 = arith.constant 0 : i32
    return %c0_i32, %arg0 : i32, i32
  }
}

</mosaic_0001>

<bundles_post_ra>
// kernel: tpu_custom_call.1
= control target key start
LH: loop header
LB: loop body
LE: loop exit
PB: predicated region body
PF: predicated region fallthrough
CT: control target
= control target key end

     0   :  { %vm33_vm0 = vcmask 1044480   ;;  %v250_v2 = vmov 0.0   ;;  %vm251_vm1 = vmmov 0   ;;  %vm29_vm2 = vcmask 39936   ;;  %s302_s0 = inlined_call_operand.vmem [shape: f32[5,4], index: 0, kind: input, shape index: {}]   ;;  %s303_s1 = inlined_call_operand.vmem [shape: f32[8,5], index: 1, kind: input, shape index: {}]   ;;  %s304_s2 = inlined_call_operand.vmem [shape: f32[8,1], index: 2, kind: input, shape index: {}]   ;;  %s305_s3 = inlined_call_operand.vmem [shape: f32[2,8], index: 3, kind: input, shape index: {}]   ;;  %s306_s4 = inlined_call_operand.vmem [shape: f32[2,1], index: 4, kind: input, shape index: {}]   ;;  %s307_s5 = inlined_call_operand.hbm [shape: f32[2,4], index: 5, kind: output, shape index: {}]  }
   0x1   :  { %v22_v0 = vld [vmem:[%s302_s0] sm:$0x1f]  ;;  %213 = vmatprep.subr.mxu0 %v250_v2  ;;  %215 = vmatprep.mubr.msk.f32.mxu0 %vm251_vm1, %v250_v2  ;;  %v252_v4 = vmov 0  }
   0x2   :  { %v21_v1 = vld [vmem:[%s303_s1] sm:$0xff]  ;;  %214 = vmatpush3.msk.msra.mxu0 %vm33_vm0, %v22_v0  ;;  %227 = vset.pattern.permute.xlu0 %v252_v4 }
   0x3   :  { %v23_v3 = vld [vmem:[%s304_s2] sm:$0xff] }
   0x4   :  { %10 = vsyncpa [#allocation3], 0  ;;  %216 = vmatmul.mubr.msk.f32.vlgmr.msra.gmra.mxu0 %vm29_vm2, %v21_v1  ;;  %26 = vperm.xlu0 %227, %v23_v3   ;;  %v109_v5 = vld [vmem:[%s306_s4] sm:$0x3]  ;;  %vm115_vm3 = vcmask 64512   ;;  %s253_s25 = smov [#allocation2]  }
   0x5   :  { %218 = vmatprep.subr.mxu1 %v250_v2  ;;  %220 = vmatprep.mubr.msk.f32.mxu1 %vm251_vm1, %v250_v2  ;;  %v108_v11 = vld [vmem:[%s305_s3] sm:$0x3]  ;;  %s198_s26 = sshll.u32 %s253_s25, 4  ;;  %vm190_vm4 = vcmask 25600   ;;  %s199_s26 = int_to_ptr.vmem [resolvable:$true] %s198_s26 }
   0x6   :  { %s228_s4 = scalar_lea.vmem %s199_s26, 32  ;;  %p233_p1 = scmp.lt.s32.totalorder %s199_s26, %s199_s26 }
   0x7   :  { %p229_p0 = scmp.ne.s32.totalorder %s199_s26, %s228_s4  ;;  %p234_p2 = scmp.lt.s32.totalorder %s228_s4, %s228_s4 }
   0x8   :  { %112 = vperm.xlu0 %227, %v109_v5  }
   0x9   :  { %p235_p3 = por %p234_p2, %p233_p1 }
   0xb   :  { %p236_p4 = pnand %p235_p3, %p229_p0 }
  0x7f   :  { %v27_v6 = vpop.permute.xlu0 %26 }
  0x83   :  { %v113_v12 = vpop.permute.xlu0 %112 }
  0xc4   :  { %v103_v7 = vpop.f32.mrf.mxu0 }
  0xc5   :  { %v104_v8 = vadd.f32 %v103_v7, %v27_v6 }
  0xc6   :  { %v217_v9 = vpop.f32.mrf.mxu0 }
  0xc7   :  { %v107_v10 = vmax.f32 %v104_v8, 0.0 }
  0xc9   :  { %219 = vmatpush3.msra.mxu1 %v107_v10 }
  0xca   :  { %221 = vmatmul.mubr.msk.f32.vlgmr.msra.gmra.mxu1 %vm115_vm3, %v108_v11 }
 0x18a   :  { %v185_v13 = vpop.f32.mrf.mxu1 }
 0x18b   :  { %v186_v14 = vadd.f32 %v185_v13, %v113_v12 }
 0x18c   :  { %v222_v15 = vpop.f32.mrf.mxu1 }
 0x18d   :  { %v189_v16 = vmax.f32 %v186_v14, 0.0 }
 0x18f   :  { %191 = vst.msk [vmem:[#allocation2] sm:$0x3] %vm190_vm4, %v189_v16 }
 0x190   :  { %239 = shalt.err (!%p236_p4)
}
 0x191   :  { %201 = dma.vmem_to_hbm [thread:$0]  %s199_s26, 32, %s307_s5, [#allocation3]  }
 0x192   :  { %248 = dma.done.wait [#allocation3], 32  }
 0x193   :  { %249 = vsyncadd [#allocation3], 4294967264 }
 0x194   :  { %205 = vsyncpa [#allocation3], 1 }

</bundles_post_ra>
